<compile_context>
chip_gen: v6e
topology: v6e:2x2x1
jax: 0.10.0
libtpu: 0.0.40
codegen_flags: <defaults>
</compile_context>

<pallas_src>
import functools

import jax
import jax.numpy as jnp
from jax.experimental import pallas as pl
from jax.experimental.pallas import tpu as pltpu


def _round_up(x, m):
    return (x + m - 1) // m * m


def _pick_tile(dim, candidates):
    for c in candidates:
        if c <= dim and dim % c == 0:
            return c
    return dim


def _leaky(y, negative_slope):
    # negative_slope in [0, 1): max(y, slope*y) == LeakyReLU; slope == 0 -> ReLU.
    return jnp.maximum(y, negative_slope * y)


# ---------------------------------------------------------------------------
# Small path: single block, whole problem resident in VMEM, no grid.
# ---------------------------------------------------------------------------
def _small_kernel(x_ref, w_ref, b_ref, g_ref, bt_ref, o_ref, *,
                  use_batchnorm, negative_slope, eps):
    # bf16 MXU operands, fp32 accumulation; cast happens in-kernel (no extra HBM pass).
    y = jnp.dot(x_ref[...].astype(jnp.bfloat16),
                w_ref[...].astype(jnp.bfloat16),
                preferred_element_type=jnp.float32)
    if use_batchnorm:
        # Bias skipped: exactly cancelled by the mean subtraction.
        mean = jnp.mean(y, axis=0, keepdims=True)
        var = jnp.mean((y - mean) * (y - mean), axis=0, keepdims=True)
        y = (y - mean) * jax.lax.rsqrt(var + eps)
        y = y * g_ref[...] + bt_ref[...]
    else:
        y = y + b_ref[...]
    o_ref[...] = _leaky(y, negative_slope).astype(o_ref.dtype)


# ---------------------------------------------------------------------------
# Tiled Linear (+bias+activation): (M, N, K) grid, accumulate into o_ref.
# ---------------------------------------------------------------------------
def _tiled_linear_kernel(x_ref, w_ref, b_ref, o_ref, *, negative_slope):
    k = pl.program_id(2)

    @pl.when(k == 0)
    def _init():
        o_ref[...] = jnp.zeros_like(o_ref)

    o_ref[...] += jnp.dot(x_ref[...].astype(jnp.bfloat16), w_ref[...],
                          preferred_element_type=jnp.float32)

    @pl.when(k == pl.num_programs(2) - 1)
    def _finalize():
        y = o_ref[...] + b_ref[...]
        o_ref[...] = _leaky(y, negative_slope)


# ---------------------------------------------------------------------------
# Tiled Linear + BatchNorm, single pass: full batch per M block (exact stats).
# Grid (N, K); used only when the full-batch footprint fits a VMEM budget.
# ---------------------------------------------------------------------------
def _tiled_bn_fullbatch_kernel(x_ref, w_ref, g_ref, bt_ref, o_ref, *,
                               negative_slope, eps):
    k = pl.program_id(1)

    @pl.when(k == 0)
    def _init():
        o_ref[...] = jnp.zeros_like(o_ref)

    o_ref[...] += jnp.dot(x_ref[...].astype(jnp.bfloat16), w_ref[...],
                          preferred_element_type=jnp.float32)

    @pl.when(k == pl.num_programs(1) - 1)
    def _finalize():
        y = o_ref[...]
        mean = jnp.mean(y, axis=0, keepdims=True)
        var = jnp.mean((y - mean) * (y - mean), axis=0, keepdims=True)
        y = (y - mean) * jax.lax.rsqrt(var + eps)
        y = y * g_ref[...] + bt_ref[...]
        o_ref[...] = _leaky(y, negative_slope)


# ---------------------------------------------------------------------------
# Tiled Linear + BatchNorm, two-pass (large B): pass 1 = matmul + per-feature
# sum / sum-of-squares accumulated across M tiles (grid (N, M, K), stats block
# resident across M and K); pass 2 = normalize + affine + activation.
# ---------------------------------------------------------------------------
def _matmul_stats_kernel(x_ref, w_ref, y_ref, sum_ref, sq_ref):
    i = pl.program_id(1)
    k = pl.program_id(2)

    @pl.when(k == 0)
    def _init_y():
        y_ref[...] = jnp.zeros_like(y_ref)

    @pl.when(jnp.logical_and(i == 0, k == 0))
    def _init_stats():
        sum_ref[...] = jnp.zeros_like(sum_ref)
        sq_ref[...] = jnp.zeros_like(sq_ref)

    y_ref[...] += jnp.dot(x_ref[...].astype(jnp.bfloat16), w_ref[...],
                          preferred_element_type=jnp.float32)

    @pl.when(k == pl.num_programs(2) - 1)
    def _stats():
        # Padded batch rows are exactly zero, so they contribute 0 to both sums.
        y = y_ref[...]
        sum_ref[...] += jnp.sum(y, axis=0, keepdims=True)
        sq_ref[...] += jnp.sum(y * y, axis=0, keepdims=True)


def _bn_act_kernel(y_ref, sum_ref, sq_ref, g_ref, bt_ref, o_ref, *,
                   batch, negative_slope, eps):
    inv_b = 1.0 / batch
    mean = sum_ref[...] * inv_b
    var = sq_ref[...] * inv_b - mean * mean
    y = (y_ref[...] - mean) * jax.lax.rsqrt(var + eps)
    y = y * g_ref[...] + bt_ref[...]
    o_ref[...] = _leaky(y, negative_slope)


# ---------------------------------------------------------------------------
# Wrapper
# ---------------------------------------------------------------------------
def linear_block(x, weight_t, bias, gamma=None, beta=None, *,
                 use_batchnorm=False, activation_func="leaky_relu",
                 eps=1e-5, force_path=None):
    """Forward pass of LinearBlock.

    x:        (B, D_in)      float32
    weight_t: (D_in, D_out)  float32  (transpose of PyTorch Linear.weight)
    bias:     (D_out,)       float32
    gamma/beta: (D_out,)     float32  (only used if use_batchnorm=True)
    force_path: None | "small" | "tiled" | "bn_two_pass"  (testing hook)
    """
    if activation_func not in ("relu", "leaky_relu"):
        raise ValueError(
            f"activation_func must be one of relu or leaky_relu, got {activation_func}")
    negative_slope = 0.2 if activation_func == "leaky_relu" else 0.0

    B, D_in = x.shape
    D_in_w, D_out = weight_t.shape
    assert D_in == D_in_w
    if gamma is None:
        gamma = jnp.ones((D_out,), jnp.float32)
    if beta is None:
        beta = jnp.zeros((D_out,), jnp.float32)
    out_dtype = x.dtype

    # ------------------ small path (no grid, no padding, no wrapper ops) ------------------
    try:
        vmem_cap = pltpu.get_tpu_info().vmem_capacity_bytes
    except Exception:  # pragma: no cover - CPU interpret / older jax
        vmem_cap = 64 * 1024 * 1024
    small_limit = min(12 * 1024 * 1024, vmem_cap // 8)

    small_bytes = (B * D_in + D_in * D_out + B * D_out) * 4 + 3 * D_out * 4
    use_small = (force_path == "small") or (force_path is None and small_bytes <= small_limit)

    if use_small:
        b2 = bias.astype(jnp.float32).reshape(1, D_out)
        g2 = gamma.astype(jnp.float32).reshape(1, D_out)
        bt2 = beta.astype(jnp.float32).reshape(1, D_out)
        out = pl.pallas_call(
            functools.partial(_small_kernel, use_batchnorm=use_batchnorm,
                              negative_slope=negative_slope, eps=eps),
            out_shape=jax.ShapeDtypeStruct((B, D_out), jnp.float32),
            compiler_params=pltpu.CompilerParams(
                vmem_limit_bytes=max(2 * small_bytes + (2 << 20), 16 << 20)),
        )(x, weight_t, b2, g2, bt2)
        return out if out.dtype == out_dtype else out.astype(out_dtype)

    # ------------------ tiled paths ------------------
    K_pad = _round_up(D_in, 128)
    N_pad = _round_up(D_out, 128)

    # Parameters: pre-pad + pre-cast once (in a real model these are hoisted out of
    # the per-call path; kept here so the script is self-contained).
    w_p = jnp.pad(weight_t.astype(jnp.bfloat16),
                  ((0, K_pad - D_in), (0, N_pad - D_out)))
    b_p = jnp.pad(bias.astype(jnp.float32), (0, N_pad - D_out)).reshape(1, N_pad)
    g_p = jnp.pad(gamma.astype(jnp.float32), (0, N_pad - D_out)).reshape(1, N_pad)
    bt_p = jnp.pad(beta.astype(jnp.float32), (0, N_pad - D_out)).reshape(1, N_pad)

    def _prep_x(b_pad):
        if b_pad == B and K_pad == D_in:
            return x            # pass f32 straight through; cast to bf16 in-kernel
        # Padding genuinely required: do pad + bf16 cast in one fused pass.
        return jnp.pad(x.astype(jnp.bfloat16), ((0, b_pad - B), (0, K_pad - D_in)))

    def _x_bytes(b_pad):
        return 4 if (b_pad == B and K_pad == D_in) else 2

    def _vmem_limit(tile_bytes):
        # double-buffered tile footprint + headroom, clamped for v7x's 64 MiB/TC
        return min(max(int(tile_bytes * 1.5) + (2 << 20), 16 << 20), 56 << 20)

    if not use_batchnorm:
        tm = 512 if B > 512 else _round_up(B, 8)
        B_pad = _round_up(B, tm)
        tn = _pick_tile(N_pad, (512, 256, 128))
        tk = _pick_tile(K_pad, (1024, 512, 256, 128))
        x_t = _prep_x(B_pad)
        xb = _x_bytes(B_pad)
        tile_bytes = (2 * tm * tk * xb + 2 * tk * tn * 2
                      + 2 * tm * tn * 4 + 2 * tn * 4)
        out_p = pl.pallas_call(
            functools.partial(_tiled_linear_kernel, negative_slope=negative_slope),
            out_shape=jax.ShapeDtypeStruct((B_pad, N_pad), jnp.float32),
            grid=(B_pad // tm, N_pad // tn, K_pad // tk),
            in_specs=[
                pl.BlockSpec((tm, tk), lambda i, j, k: (i, k)),
                pl.BlockSpec((tk, tn), lambda i, j, k: (k, j)),
                pl.BlockSpec((1, tn), lambda i, j, k: (0, j)),
            ],
            out_specs=pl.BlockSpec((tm, tn), lambda i, j, k: (i, j)),
            compiler_params=pltpu.CompilerParams(
                dimension_semantics=("parallel", "parallel", "arbitrary"),
                vmem_limit_bytes=_vmem_limit(tile_bytes)),
        )(x_t, w_p, b_p)
        out = out_p if (B_pad == B and N_pad == D_out) else out_p[:B, :D_out]
        return out if out.dtype == out_dtype else out.astype(out_dtype)

    # -------- BatchNorm, single pass (full batch per M block) if it fits VMEM --------
    if force_path != "bn_two_pass":
        # Prefer >= 2 N tiles so the second v7x TensorCore has work (M grid == 1 here).
        tn_cands = [c for c in (512, 256, 128) if N_pad % c == 0 and N_pad // c >= 2]
        if not tn_cands:
            tn_cands = [_pick_tile(N_pad, (512, 256, 128))]
        xb = 4 if K_pad == D_in else 2
        full_fit = None
        for tn_c in tn_cands:
            for tk_c in (1024, 512, 256, 128):
                if tk_c > K_pad or K_pad % tk_c != 0:
                    continue
                fp = (2 * B * tk_c * xb + 2 * tk_c * tn_c * 2
                      + 2 * B * tn_c * 4 + 2 * tn_c * 4)
                if fp <= 24 * 1024 * 1024:
                    full_fit = (tn_c, tk_c, fp)
                    break
            if full_fit is not None:
                break

        if full_fit is not None:
            tn, tk, fp = full_fit
            x_t = _prep_x(B)   # exact stats: no batch padding, pad K only if needed
            out_p = pl.pallas_call(
                functools.partial(_tiled_bn_fullbatch_kernel,
                                  negative_slope=negative_slope, eps=eps),
                out_shape=jax.ShapeDtypeStruct((B, N_pad), jnp.float32),
                grid=(N_pad // tn, K_pad // tk),
                in_specs=[
                    pl.BlockSpec((B, tk), lambda j, k: (0, k)),
                    pl.BlockSpec((tk, tn), lambda j, k: (k, j)),
                    pl.BlockSpec((1, tn), lambda j, k: (0, j)),
                    pl.BlockSpec((1, tn), lambda j, k: (0, j)),
                ],
                out_specs=pl.BlockSpec((B, tn), lambda j, k: (0, j)),
                compiler_params=pltpu.CompilerParams(
                    dimension_semantics=("parallel", "arbitrary"),
                    vmem_limit_bytes=_vmem_limit(fp)),
            )(x_t, w_p, g_p, bt_p)
            out = out_p if N_pad == D_out else out_p[:, :D_out]
            return out if out.dtype == out_dtype else out.astype(out_dtype)

    # -------- BatchNorm, two-pass (bounded tm; cross-M-tile statistics) --------
    tm = 512 if B > 512 else _round_up(B, 8)
    B_pad = _round_up(B, tm)
    tn = _pick_tile(N_pad, (512, 256, 128))
    tk = _pick_tile(K_pad, (1024, 512, 256, 128))
    x_t = _prep_x(B_pad)
    xb = _x_bytes(B_pad)
    tile_bytes = (2 * tm * tk * xb + 2 * tk * tn * 2
                  + 2 * tm * tn * 4 + 4 * tn * 4)

    # Pass 1: y = x @ W (f32) + per-feature sum / sum-of-squares.
    # TODO(synk): y could be stored bf16 to halve intermediate HBM traffic if the
    # accuracy budget allows.
    y_p, s_p, sq_p = pl.pallas_call(
        _matmul_stats_kernel,
        out_shape=(jax.ShapeDtypeStruct((B_pad, N_pad), jnp.float32),
                   jax.ShapeDtypeStruct((1, N_pad), jnp.float32),
                   jax.ShapeDtypeStruct((1, N_pad), jnp.float32)),
        grid=(N_pad // tn, B_pad // tm, K_pad // tk),
        in_specs=[
            pl.BlockSpec((tm, tk), lambda j, i, k: (i, k)),
            pl.BlockSpec((tk, tn), lambda j, i, k: (k, j)),
        ],
        out_specs=(pl.BlockSpec((tm, tn), lambda j, i, k: (i, j)),
                   pl.BlockSpec((1, tn), lambda j, i, k: (0, j)),
                   pl.BlockSpec((1, tn), lambda j, i, k: (0, j))),
        compiler_params=pltpu.CompilerParams(
            dimension_semantics=("parallel", "arbitrary", "arbitrary"),
            vmem_limit_bytes=_vmem_limit(tile_bytes)),
    )(x_t, w_p)

    # Pass 2: normalize + affine + activation, written in place over y (aliased).
    out_p = pl.pallas_call(
        functools.partial(_bn_act_kernel, batch=float(B),
                          negative_slope=negative_slope, eps=eps),
        out_shape=jax.ShapeDtypeStruct((B_pad, N_pad), jnp.float32),
        grid=(B_pad // tm, N_pad // tn),
        in_specs=[
            pl.BlockSpec((tm, tn), lambda i, j: (i, j)),
            pl.BlockSpec((1, tn), lambda i, j: (0, j)),
            pl.BlockSpec((1, tn), lambda i, j: (0, j)),
            pl.BlockSpec((1, tn), lambda i, j: (0, j)),
            pl.BlockSpec((1, tn), lambda i, j: (0, j)),
        ],
        out_specs=pl.BlockSpec((tm, tn), lambda i, j: (i, j)),
        input_output_aliases={0: 0},
        compiler_params=pltpu.CompilerParams(
            dimension_semantics=("parallel", "parallel"),
            vmem_limit_bytes=_vmem_limit(4 * tm * tn * 4 + 8 * tn * 4)),
    )(y_p, s_p, sq_p, g_p, bt_p)
    out = out_p if (B_pad == B and N_pad == D_out) else out_p[:B, :D_out]
    return out if out.dtype == out_dtype else out.astype(out_dtype)


# ---------------------------------------------------------------------------
# Reference (bf16-rounded matmul operands, matching the kernel's MXU dtype).
# ---------------------------------------------------------------------------
def _reference(x, weight_t, bias, gamma, beta, *, use_batchnorm,
               activation_func, eps=1e-5):
    xb = x.astype(jnp.bfloat16).astype(jnp.float32)
    wb = weight_t.astype(jnp.bfloat16).astype(jnp.float32)
    y = xb @ wb
    if use_batchnorm:
        mean = jnp.mean(y, axis=0, keepdims=True)
        var = jnp.mean((y - mean) ** 2, axis=0, keepdims=True)
        y = (y - mean) / jnp.sqrt(var + eps)
        y = y * gamma + beta
    else:
        y = y + bias
    if activation_func == "relu":
        return jnp.maximum(y, 0.0)
    return jnp.where(y > 0, y, 0.2 * y)


if __name__ == "__main__":
    key = jax.random.PRNGKey(0)
    k_x, k_w, k_b, k_x2, k_w2, k_b2 = jax.random.split(key, 6)

    # ---- Small path (module-default config): batch=8, 32 -> 64 ----
    batch, input_dim, output_dim = 8, 32, 64
    x = jax.random.normal(k_x, (batch, input_dim), dtype=jnp.float32)
    bound = 1.0 / jnp.sqrt(jnp.float32(input_dim))
    weight_t = jax.random.uniform(k_w, (input_dim, output_dim),
                                  minval=-bound, maxval=bound, dtype=jnp.float32)
    bias = jax.random.uniform(k_b, (output_dim,),
                              minval=-bound, maxval=bound, dtype=jnp.float32)
    gamma = jnp.ones((output_dim,), dtype=jnp.float32)
    beta = jnp.zeros((output_dim,), dtype=jnp.float32)

    out = jax.block_until_ready(
        linear_block(x, weight_t, bias, gamma, beta,
                     use_batchnorm=False, activation_func="leaky_relu"))
    ref = _reference(x, weight_t, bias, gamma, beta,
                     use_batchnorm=False, activation_func="leaky_relu")
    assert out.shape == (batch, output_dim)
    assert jnp.allclose(out, ref, atol=5e-3, rtol=5e-3)

    out_bn = jax.block_until_ready(
        linear_block(x, weight_t, bias, gamma, beta,
                     use_batchnorm=True, activation_func="relu"))
    ref_bn = _reference(x, weight_t, bias, gamma, beta,
                        use_batchnorm=True, activation_func="relu")
    assert jnp.allclose(out_bn, ref_bn, atol=5e-3, rtol=5e-3)

    # ---- Tiled paths (forced): batch=16, 384 -> 384 ----
    B2, D2_in, D2_out = 16, 384, 384
    x2 = jax.random.normal(k_x2, (B2, D2_in), dtype=jnp.float32)
    bound2 = 1.0 / jnp.sqrt(jnp.float32(D2_in))
    w2 = jax.random.uniform(k_w2, (D2_in, D2_out),
                            minval=-bound2, maxval=bound2, dtype=jnp.float32)
    b2 = jax.random.uniform(k_b2, (D2_out,),
                            minval=-bound2, maxval=bound2, dtype=jnp.float32)
    g2 = jnp.ones((D2_out,), dtype=jnp.float32)
    be2 = jnp.zeros((D2_out,), dtype=jnp.float32)

    out2 = jax.block_until_ready(
        linear_block(x2, w2, b2, g2, be2, use_batchnorm=False,
                     activation_func="leaky_relu", force_path="tiled"))
    ref2 = _reference(x2, w2, b2, g2, be2,
                      use_batchnorm=False, activation_func="leaky_relu")
    assert jnp.allclose(out2, ref2, atol=5e-3, rtol=5e-3)

    out2_bn = jax.block_until_ready(
        linear_block(x2, w2, b2, g2, be2, use_batchnorm=True,
                     activation_func="relu", force_path="tiled"))
    ref2_bn = _reference(x2, w2, b2, g2, be2,
                         use_batchnorm=True, activation_func="relu")
    assert jnp.allclose(out2_bn, ref2_bn, atol=5e-3, rtol=5e-3)

    out2_bn2 = jax.block_until_ready(
        linear_block(x2, w2, b2, g2, be2, use_batchnorm=True,
                     activation_func="leaky_relu", force_path="bn_two_pass"))
    ref2_bn2 = _reference(x2, w2, b2, g2, be2,
                          use_batchnorm=True, activation_func="leaky_relu")
    assert jnp.allclose(out2_bn2, ref2_bn2, atol=5e-3, rtol=5e-3)

    print("KERNEL_OK")
</pallas_src>

<mosaic_0001>
module attributes {stable_mosaic.version = 11 : i64} {
  func.func @_small_kernel(%arg0: memref<8x32xf32, #tpu.memory_space<vmem>>, %arg1: memref<32x64xf32, #tpu.memory_space<vmem>>, %arg2: memref<1x64xf32, #tpu.memory_space<vmem>>, %arg3: memref<1x64xf32, #tpu.memory_space<vmem>>, %arg4: memref<1x64xf32, #tpu.memory_space<vmem>>, %arg5: memref<8x64xf32, #tpu.memory_space<vmem>>) attributes {dimension_semantics = [], scalar_prefetch = 0 : i64, scratch_operands = 0 : i64, tpu.core_type = #tpu.core_type<tc>} {
    %c0 = arith.constant 0 : index
    %c0_0 = arith.constant 0 : index
    %0 = vector.load %arg0[%c0, %c0_0] : memref<8x32xf32, #tpu.memory_space<vmem>>, vector<8x32xf32>
    %1 = arith.truncf %0 : vector<8x32xf32> to vector<8x32xbf16>
    %c0_1 = arith.constant 0 : index
    %c0_2 = arith.constant 0 : index
    %2 = vector.load %arg1[%c0_1, %c0_2] : memref<32x64xf32, #tpu.memory_space<vmem>>, vector<32x64xf32>
    %3 = arith.truncf %2 : vector<32x64xf32> to vector<32x64xbf16>
    %cst = arith.constant dense<0.000000e+00> : vector<8x64xf32>
    %4 = tpu.matmul %1, %3, %cst {dimension_numbers = #tpu.dot_dimension_numbers<[1], [0], [0], [1], [0, 0, 1, 1], [], []>} : vector<8x32xbf16>, vector<32x64xbf16>, vector<8x64xf32> -> vector<8x64xf32>
    %c0_3 = arith.constant 0 : index
    %c0_4 = arith.constant 0 : index
    %5 = vector.load %arg2[%c0_3, %c0_4] : memref<1x64xf32, #tpu.memory_space<vmem>>, vector<1x64xf32>
    %6 = vector.broadcast %5 : vector<1x64xf32> to vector<8x64xf32>
    %7 = arith.addf %4, %6 : vector<8x64xf32>
    %cst_5 = arith.constant 2.000000e-01 : f32
    %8 = vector.broadcast %cst_5 : f32 to vector<8x64xf32>
    %9 = arith.mulf %8, %7 : vector<8x64xf32>
    %10 = arith.maximumf %7, %9 : vector<8x64xf32>
    %c0_6 = arith.constant 0 : index
    %c0_7 = arith.constant 0 : index
    %11 = vector.load %arg5[%c0_6, %c0_7] : memref<8x64xf32, #tpu.memory_space<vmem>>, vector<8x64xf32>
    tpu.vector_store %arg5[%c0_6, %c0_7], %10 {strides = array<i32>} : memref<8x64xf32, #tpu.memory_space<vmem>>, vector<8x64xf32>,
    return
  }
}

</mosaic_0001>

<bundles_post_ra>
// kernel: tpu_custom_call.1
= control target key start
LH: loop header
LB: loop body
LE: loop exit
PB: predicated region body
PF: predicated region fallthrough
CT: control target
= control target key end

     0   :  { %10 = vsyncpa [#allocation3], 0  ;;  %s262_s0 = inlined_call_operand.hbm [shape: f32[8,32], index: 0, kind: input, shape index: {}]   ;;  %s263_s1 = inlined_call_operand.hbm [shape: f32[32,64], index: 1, kind: input, shape index: {}]   ;;  %s264_s2 = inlined_call_operand.vmem [shape: f32[1,64], index: 2, kind: input, shape index: {}]   ;;  %s265_s3 = inlined_call_operand.vmem [shape: f32[1,64], index: 3, kind: input, shape index: {}]   ;;  %s266_s4 = inlined_call_operand.vmem [shape: f32[1,64], index: 4, kind: input, shape index: {}]   ;;  %s267_s5 = inlined_call_operand.hbm [shape: f32[8,64], index: 5, kind: output, shape index: {}]  }
   0x1   :  { %11 = vsyncpa [#allocation6], 0 }
   0x2   :  { %12 = vsyncpa [#allocation4], 0  ;;  %s213_s18 = smov [#allocation2]   ;;  %s214_s20 = smov [#allocation5]  }
   0x3   :  { %s19_s19 = sshll.u32 %s213_s18, 4  ;;  %s28_s21 = sshll.u32 %s214_s20, 4  ;;  %s20_s19 = int_to_ptr.vmem [resolvable:$true] %s19_s19  ;;  %s29_s21 = int_to_ptr.vmem [resolvable:$true] %s28_s21 }
   0x4   :  { %s155_s22 = scalar_lea.vmem %s20_s19, 128  ;;  %p160_p1 = scmp.lt.s32.totalorder %s20_s19, %s20_s19 }
   0x5   :  { %p156_p0 = scmp.ne.s32.totalorder %s20_s19, %s155_s22  ;;  %p161_p2 = scmp.lt.s32.totalorder %s155_s22, %s155_s22 }
   0x7   :  { %p162_p3 = por %p161_p2, %p160_p1 }
   0x9   :  { %p163_p4 = pnand %p162_p3, %p156_p0 }
   0xb   :  { %166 = shalt.err (!%p163_p4)
}
   0xc   :  { %22 = dma.hbm_to_vmem [thread:$0]  %s262_s0, 128, %s20_s19, [#allocation3]  }
   0xd   :  { %s175_s23 = scalar_lea.vmem %s29_s21, 512  ;;  %p180_p6 = scmp.lt.s32.totalorder %s29_s21, %s29_s21 }
   0xe   :  { %p176_p5 = scmp.ne.s32.totalorder %s29_s21, %s175_s23  ;;  %p181_p7 = scmp.lt.s32.totalorder %s175_s23, %s175_s23 }
  0x10   :  { %p182_p8 = por %p181_p7, %p180_p6 }
  0x12   :  { %p183_p9 = pnand %p182_p8, %p176_p5 }
  0x14   :  { %186 = shalt.err (!%p183_p9)
}
  0x15   :  { %s215_s24 = smov 128   ;;  %s216_s25 = smov 8  }
  0x16   :  { %34 = dma.hbm_to_vmem [thread:$0]  %s263_s1, 512, %s29_s21, [#allocation6], %s215_s24, %s215_s24, %s216_s25  }
  0x17   :  { %207 = dma.done.wait [#allocation3], 128  }
  0x18   :  { %208 = vsyncadd [#allocation3], 4294967168 }
  0x19   :  { %209 = dma.done.wait [#allocation6], 512  }
  0x1a   :  { %210 = vsyncadd [#allocation6], 4294966784  ;;  %v217_v0 = vmov 0.0   ;;  %vm218_vm0 = vmmov 0   ;;  %v52_v1 = vld [vmem:[#allocation5 + $0x10] sm:$0xff]  ;;  %v53_v2 = vld [vmem:[#allocation5 + $0x18] sm:$0xff] }
  0x1b   :  { %132 = vmatprep.subr.bf16.mxu0 %v217_v0  ;;  %136 = vmatprep.mubr.msk.bf16.mxu0 %vm218_vm0, %v217_v0  ;;  %v50_v3 = vld [vmem:[#allocation5] sm:$0xff]  ;;  %v55_v4 = vpack.c.bf16 %v53_v2, %v52_v1  ;;  %v51_v5 = vld [vmem:[#allocation5 + $0x8] sm:$0xff]  ;;  %v48_v7 = vld [vmem:[#allocation2] sm:$0xff]  ;;  %vm63_vm1 = vcmask 261120   ;;  %s219_s28 = smov [#allocation7]   ;;  %vm109_vm2 = vcmask 523264  }
  0x1c   :  { %v54_v6 = vpack.c.bf16 %v51_v5, %v50_v3  ;;  %v49_v8 = vpack.c.bf16 %v48_v7, %v48_v7  ;;  %v127_v9 = vld [vmem:[%s264_s2] ss:$0 sm:$0xff]  ;;  %s117_s29 = sshll.u32 %s219_s28, 4  ;;  %s118_s29 = int_to_ptr.vmem [resolvable:$true] %s117_s29 }
  0x1d   :  { %133 = vmatpush3.bf16.msra.mxu0 %v55_v4  ;;  %s187_s30 = scalar_lea.vmem %s118_s29, 128  ;;  %p192_p11 = scmp.lt.s32.totalorder %s118_s29, %s118_s29 }
  0x1e   :  { %134 = vmatprep.subr.bf16.mxu0 %v217_v0  ;;  %p188_p10 = scmp.ne.s32.totalorder %s118_s29, %s187_s30  ;;  %p193_p12 = scmp.lt.s32.totalorder %s187_s30, %s187_s30 }
  0x20   :  { %p194_p13 = por %p193_p12, %p192_p11 }
  0x21   :  { %135 = vmatpush3.bf16.msra.mxu0 %v54_v6 }
  0x22   :  { %p195_p0 = pnand %p194_p13, %p188_p10 }
  0x24   :  { %137 = vmatmul.mubr.msk.bf16.vlgmr.msra.gmra.mxu0 %vm63_vm1, %v49_v8 }
  0xe4   :  { %v101_v10 = vpop.f32.mrf.mxu0 }
  0xe5   :  { %v102_v11 = vadd.f32 %v127_v9, %v101_v10 }
  0xe6   :  { %v138_v12 = vpop.f32.mrf.mxu0 }
  0xe7   :  { %v107_v13 = vmul.f32 0.2, %v102_v11 }
  0xe8   :  { %v104_v14 = vpop.f32.mrf.mxu0 }
  0xe9   :  { %v108_v15 = vmax.f32 %v102_v11, %v107_v13 }
  0xea   :  { %v139_v16 = vpop.f32.mrf.mxu0 }
  0xeb   :  { %110 = vst.msk [vmem:[#allocation7] sm:$0xff] %vm109_vm2, %v108_v15 }
  0xec   :  { %198 = shalt.err (!%p195_p0)
}
  0xed   :  { %120 = dma.vmem_to_hbm [thread:$0]  %s118_s29, 128, %s267_s5, [#allocation4]  }
  0xee   :  { %211 = dma.done.wait [#allocation4], 128  }
  0xef   :  { %212 = vsyncadd [#allocation4], 4294967168 }
  0xf0   :  { %124 = vsyncpa [#allocation3], 1 }
  0xf1   :  { %125 = vsyncpa [#allocation6], 1 }
  0xf2   :  { %126 = vsyncpa [#allocation4], 1 }

</bundles_post_ra>
